<compile_context>
chip_gen: v6e
topology: v6e:2x2x1
jax: 0.10.0
libtpu: 0.0.40
codegen_flags: <defaults>
</compile_context>

<pallas_src>
import jax
import jax.numpy as jnp
from jax.experimental import pallas as pl
from jax.experimental.pallas import tpu as pltpu

STANDARD_NT = "ACGT"


def _make_concat_kernel(n_inputs):
    """Kernel that writes one lane-dense block: concat(inputs, axis=-1)."""
    if n_inputs == 1:
        def kernel(x_ref, o_ref):
            o_ref[...] = x_ref[...]
        return kernel

    def kernel(*refs):
        o_ref = refs[n_inputs]
        # Single full-width store of the whole output block; the (unaligned)
        # concat offsets are resolved in registers, not with masked stores.
        o_ref[...] = jnp.concatenate(
            [refs[i][...] for i in range(n_inputs)], axis=-1)
    return kernel


def _sublane_tile(dtype):
    # 8 rows for f32, 16 for bf16, 32 for int8/fp8 — what VMEM actually pads to.
    return max(8, 32 // jnp.dtype(dtype).itemsize)


def _vmem_block_bytes(bt, C, Ls, Ll, Lr, dtype):
    """Real (padded) VMEM bytes for one grid step's buffers."""
    item = jnp.dtype(dtype).itemsize
    sub = _sublane_tile(dtype)
    rows = -(-(bt * C) // sub) * sub          # sublane-padded row count
    Ltot = Ll + Ls + Lr
    # sample block + output block (double-buffered) + pre-tiled flank blocks.
    return 2 * rows * (Ls + Ltot) * item + 2 * rows * (Ll + Lr) * item


def _pick_batch_block(B, C, Ls, Ll, Lr, dtype,
                      budget_bytes=24 << 20,     # fits v7x scoped 32 MiB w/ headroom
                      min_block_bytes=2 << 20,   # keep DMAs on the HBM roofline
                      target_steps=4):
    sub = _sublane_tile(dtype)
    divisors = [d for d in range(1, B + 1) if B % d == 0]
    # Prefer row blocks that are a multiple of the sublane tile (or the full
    # array) so the BlockSpec's second-to-last dim is always legal/aligned.
    aligned = [d for d in divisors if (d * C) % sub == 0 or d == B]

    def fits(ds):
        return [d for d in ds if _vmem_block_bytes(d, C, Ls, Ll, Lr, dtype) <= budget_bytes]

    fitting = fits(aligned) or fits(divisors)
    bt = max(fitting) if fitting else min(aligned)

    # Only shrink further to get >= target_steps pipelined steps (and an even
    # count for v7x's 2 TCs) if the blocks stay comfortably large.
    if B // bt < target_steps:
        cands = [d for d in (fits(aligned) or fits(divisors))
                 if B // d >= target_steps
                 and _vmem_block_bytes(d, C, Ls, Ll, Lr, dtype) >= min_block_bytes]
        if cands:
            even = [d for d in cands if (B // d) % 2 == 0]
            bt = max(even) if even else max(cands)
    return bt


def build_flanks(sample, left_flank=None, right_flank=None, *, block_batch=None):
    """Pallas equivalent of FlankBuilder.forward (batch_dim=0, cat_axis=-1)."""
    # TODO(synk): only the module defaults (batch_dim=0, cat_axis=-1, single
    # leading batch dim) are implemented; other cat axes are out of scope.
    B, C, Ls = sample.shape
    dtype = sample.dtype

    def _prep(f):
        if f is None:
            return None
        f = jnp.asarray(f, dtype).reshape(C, -1)   # accepts (1, C, L) or (C, L)
        return None if f.shape[-1] == 0 else f     # zero-length flank -> skip

    left, right = _prep(left_flank), _prep(right_flank)
    Ll = 0 if left is None else left.shape[-1]
    Lr = 0 if right is None else right.shape[-1]
    Ltot = Ll + Ls + Lr

    if block_batch is not None:
        assert B % block_batch == 0, "block_batch must divide the batch size"
        Bt = block_batch
    else:
        Bt = _pick_batch_block(B, C, Ls, Ll, Lr, dtype)
    rows, Rt = B * C, Bt * C
    grid = (B // Bt,)

    # Fold (batch, channel) into one row axis; free row-major reshape.
    x2 = sample.reshape(rows, Ls)

    operands, in_specs = [], []
    if left is not None:
        # Pre-tile to the block height so the in-kernel flank write is a plain
        # repeating-row copy (pattern repeats every C rows, matching the fold).
        operands.append(jnp.tile(left, (Bt, 1)))                 # (Rt, Ll)
        in_specs.append(pl.BlockSpec((Rt, Ll), lambda r: (0, 0)))
    operands.append(x2)
    in_specs.append(pl.BlockSpec((Rt, Ls), lambda r: (r, 0)))
    if right is not None:
        operands.append(jnp.tile(right, (Bt, 1)))                # (Rt, Lr)
        in_specs.append(pl.BlockSpec((Rt, Lr), lambda r: (0, 0)))

    need_bytes = _vmem_block_bytes(Bt, C, Ls, Ll, Lr, dtype)
    # Raise the scoped VMEM limit past the per-generation defaults when needed,
    # but stay well under v7x's 64 MiB physical VMEM per core.
    vmem_limit = int(min(max(need_bytes + (2 << 20), 16 << 20), 48 << 20))

    out2 = pl.pallas_call(
        _make_concat_kernel(len(operands)),
        out_shape=jax.ShapeDtypeStruct((rows, Ltot), dtype),
        grid=grid,
        in_specs=in_specs,
        out_specs=pl.BlockSpec((Rt, Ltot), lambda r: (r, 0)),
        compiler_params=pltpu.CompilerParams(
            dimension_semantics=("parallel",),
            vmem_limit_bytes=vmem_limit),
    )(*operands)
    return out2.reshape(B, C, Ltot)


def build_flanks_reference(sample, left_flank=None, right_flank=None):
    # Literal pure-JAX transcription of FlankBuilder.forward.
    B, C, Ls = sample.shape
    pieces = []
    if left_flank is not None:
        lf = jnp.asarray(left_flank, sample.dtype).reshape(C, -1)
        pieces.append(jnp.broadcast_to(lf[None], (B,) + lf.shape))
    pieces.append(sample)
    if right_flank is not None:
        rf = jnp.asarray(right_flank, sample.dtype).reshape(C, -1)
        pieces.append(jnp.broadcast_to(rf[None], (B,) + rf.shape))
    return jnp.concatenate(pieces, axis=-1)


if __name__ == "__main__":
    C = len(STANDARD_NT)                 # 4 nucleotide channels

    # --- Test 1: module-default small shapes, single grid step ---------------
    B, Ls, Ll, Lr = 2, 16, 8, 8
    k_s, k_l, k_r = jax.random.split(jax.random.PRNGKey(0), 3)
    sample = jax.nn.one_hot(
        jax.random.randint(k_s, (B, Ls), 0, C), C, axis=1, dtype=jnp.float32)   # (B, C, Ls)
    left_flank = jax.nn.one_hot(
        jax.random.randint(k_l, (1, Ll), 0, C), C, axis=1, dtype=jnp.float32)   # (1, C, Ll)
    right_flank = jax.nn.one_hot(
        jax.random.randint(k_r, (1, Lr), 0, C), C, axis=1, dtype=jnp.float32)   # (1, C, Lr)

    out = jax.block_until_ready(build_flanks(sample, left_flank, right_flank))
    ref = build_flanks_reference(sample, left_flank, right_flank)
    assert out.shape == (B, C, Ll + Ls + Lr), out.shape
    assert jnp.array_equal(out, ref), float(jnp.abs(out - ref).max())

    # --- Test 2: multi-step grid (forced small batch block), unaligned flanks
    B2, Ls2, Ll2, Lr2 = 8, 32, 12, 20
    k_s2, k_l2, k_r2 = jax.random.split(jax.random.PRNGKey(1), 3)
    sample2 = jax.nn.one_hot(
        jax.random.randint(k_s2, (B2, Ls2), 0, C), C, axis=1, dtype=jnp.float32)
    left2 = jax.nn.one_hot(
        jax.random.randint(k_l2, (1, Ll2), 0, C), C, axis=1, dtype=jnp.float32)
    right2 = jax.nn.one_hot(
        jax.random.randint(k_r2, (1, Lr2), 0, C), C, axis=1, dtype=jnp.float32)

    out2 = jax.block_until_ready(
        build_flanks(sample2, left2, right2, block_batch=2))   # grid = (4,)
    ref2 = build_flanks_reference(sample2, left2, right2)
    assert out2.shape == (B2, C, Ll2 + Ls2 + Lr2), out2.shape
    assert jnp.array_equal(out2, ref2), float(jnp.abs(out2 - ref2).max())

    print("KERNEL_OK")
</pallas_src>

<mosaic_0001>
module attributes {stable_mosaic.version = 11 : i64} {
  func.func @kernel(%arg0: i32, %arg1: memref<8x8xf32, #tpu.memory_space<vmem>>, %arg2: memref<8x16xf32, #tpu.memory_space<vmem>>, %arg3: memref<8x8xf32, #tpu.memory_space<vmem>>, %arg4: memref<8x32xf32, #tpu.memory_space<vmem>>) attributes {dimension_semantics = [#tpu.dimension_semantics<parallel>], iteration_bounds = array<i64: 1>, scalar_prefetch = 0 : i64, scratch_operands = 0 : i64, tpu.core_type = #tpu.core_type<tc>, window_params = [{pipeline_mode = #tpu.pipeline_mode<synchronous>, transform_indices = @transform_0, window_bounds = array<i64: 8, 8>}, {transform_indices = @transform_1, window_bounds = array<i64: 8, 16>}, {pipeline_mode = #tpu.pipeline_mode<synchronous>, transform_indices = @transform_2, window_bounds = array<i64: 8, 8>}, {transform_indices = @transform_3, window_bounds = array<i64: 8, 32>}]} {
    %c0 = arith.constant 0 : index
    %c0_0 = arith.constant 0 : index
    %0 = vector.load %arg1[%c0, %c0_0] : memref<8x8xf32, #tpu.memory_space<vmem>>, vector<8x8xf32>
    %c0_1 = arith.constant 0 : index
    %c0_2 = arith.constant 0 : index
    %1 = vector.load %arg2[%c0_1, %c0_2] : memref<8x16xf32, #tpu.memory_space<vmem>>, vector<8x16xf32>
    %c0_3 = arith.constant 0 : index
    %c0_4 = arith.constant 0 : index
    %2 = vector.load %arg3[%c0_3, %c0_4] : memref<8x8xf32, #tpu.memory_space<vmem>>, vector<8x8xf32>
    %3 = tpu.concatenate %0, %1, %2 in 1 : vector<8x8xf32>, vector<8x16xf32>, vector<8x8xf32> -> vector<8x32xf32>
    %c0_5 = arith.constant 0 : index
    %c0_6 = arith.constant 0 : index
    %4 = vector.load %arg4[%c0_5, %c0_6] : memref<8x32xf32, #tpu.memory_space<vmem>>, vector<8x32xf32>
    tpu.vector_store %arg4[%c0_5, %c0_6], %3 {strides = array<i32>} : memref<8x32xf32, #tpu.memory_space<vmem>>, vector<8x32xf32>,
    return
  }
  func.func @transform_0(%arg0: i32) -> (i32, i32) {
    %c0_i32 = arith.constant 0 : i32
    %c0_i32_0 = arith.constant 0 : i32
    %c0_i32_1 = arith.constant 0 : i32
    return %c0_i32, %c0_i32_0 : i32, i32
  }
  func.func @transform_1(%arg0: i32) -> (i32, i32) {
    %c0_i32 = arith.constant 0 : i32
    %c0_i32_0 = arith.constant 0 : i32
    return %arg0, %c0_i32 : i32, i32
  }
  func.func @transform_2(%arg0: i32) -> (i32, i32) {
    %c0_i32 = arith.constant 0 : i32
    %c0_i32_0 = arith.constant 0 : i32
    %c0_i32_1 = arith.constant 0 : i32
    return %c0_i32, %c0_i32_0 : i32, i32
  }
  func.func @transform_3(%arg0: i32) -> (i32, i32) {
    %c0_i32 = arith.constant 0 : i32
    %c0_i32_0 = arith.constant 0 : i32
    return %arg0, %c0_i32 : i32, i32
  }
}

</mosaic_0001>

<bundles_post_ra>
// kernel: tpu_custom_call.1
= control target key start
LH: loop header
LB: loop body
LE: loop exit
PB: predicated region body
PF: predicated region fallthrough
CT: control target
= control target key end

     0   :  { %8 = vsyncpa [#allocation3], 0  ;;  %s213_s0 = inlined_call_operand.hbm [shape: f32[8,8], index: 0, kind: input, shape index: {}]   ;;  %s214_s1 = inlined_call_operand.hbm [shape: f32[8,16], index: 1, kind: input, shape index: {}]   ;;  %s215_s2 = inlined_call_operand.hbm [shape: f32[8,8], index: 2, kind: input, shape index: {}]   ;;  %s216_s3 = inlined_call_operand.hbm [shape: f32[8,32], index: 3, kind: output, shape index: {}]  }
   0x1   :  { %9 = vsyncpa [#allocation6], 0 }
   0x2   :  { %10 = vsyncpa [#allocation4], 0  ;;  %s175_s12 = smov [#allocation5]   ;;  %s176_s14 = smov [#allocation2]  }
   0x3   :  { %s27_s13 = sshll.u32 %s175_s12, 4  ;;  %s17_s15 = sshll.u32 %s176_s14, 4  ;;  %s28_s13 = int_to_ptr.vmem [resolvable:$true] %s27_s13  ;;  %s18_s15 = int_to_ptr.vmem [resolvable:$true] %s17_s15 }
   0x4   :  { %s97_s16 = scalar_lea.vmem %s28_s13, 128  ;;  %p102_p1 = scmp.lt.s32.totalorder %s28_s13, %s28_s13 }
   0x5   :  { %p98_p0 = scmp.ne.s32.totalorder %s28_s13, %s97_s16  ;;  %p103_p2 = scmp.lt.s32.totalorder %s97_s16, %s97_s16 }
   0x7   :  { %p104_p3 = por %p103_p2, %p102_p1 }
   0x9   :  { %p105_p4 = pnand %p104_p3, %p98_p0 }
   0xb   :  { %108 = shalt.err (!%p105_p4)
}
   0xc   :  { %30 = dma.hbm_to_vmem [thread:$0]  %s214_s1, 128, %s28_s13, [#allocation6]  }
   0xd   :  { %s117_s19 = scalar_lea.vmem %s18_s15, 128  ;;  %p122_p6 = scmp.lt.s32.totalorder %s18_s15, %s18_s15 }
   0xe   :  { %p118_p5 = scmp.ne.s32.totalorder %s18_s15, %s117_s19  ;;  %p123_p7 = scmp.lt.s32.totalorder %s117_s19, %s117_s19 }
  0x10   :  { %p124_p8 = por %p123_p7, %p122_p6 }
  0x12   :  { %p125_p9 = pnand %p124_p8, %p118_p5 }
  0x14   :  { %128 = shalt.err (!%p125_p9)
}
  0x15   :  { %20 = dma.hbm_to_vmem [thread:$0]  %s213_s0, 128, %s18_s15, [#allocation3]  }
  0x16   :  { %s177_s22 = smov [#allocation7]  }
  0x17   :  { %s37_s23 = sshll.u32 %s177_s22, 4  ;;  %s38_s23 = int_to_ptr.vmem [resolvable:$true] %s37_s23 }
  0x18   :  { %s137_s24 = scalar_lea.vmem %s38_s23, 128  ;;  %p142_p11 = scmp.lt.s32.totalorder %s38_s23, %s38_s23 }
  0x19   :  { %p138_p10 = scmp.ne.s32.totalorder %s38_s23, %s137_s24  ;;  %p143_p12 = scmp.lt.s32.totalorder %s137_s24, %s137_s24 }
  0x1b   :  { %p144_p13 = por %p143_p12, %p142_p11 }
  0x1d   :  { %p145_p0 = pnand %p144_p13, %p138_p10 }
  0x1f   :  { %148 = shalt.err (!%p145_p0)
}
  0x20   :  { %40 = dma.hbm_to_vmem [thread:$0]  %s215_s2, 128, %s38_s23, [#allocation6]  }
  0x21   :  { %169 = dma.done.wait [#allocation3], 128  }
  0x22   :  { %170 = vsyncadd [#allocation3], 4294967168 }
  0x23   :  { %171 = dma.done.wait [#allocation6], 256  }
  0x24   :  { %172 = vsyncadd [#allocation6], 4294967040  ;;  %v51_v0 = vld [vmem:[#allocation5] sm:$0xff]  ;;  %s178_s0 = smov 8   ;;  %v52_v1 = vld [vmem:[#allocation7] sm:$0xff]  ;;  %s179_s26 = smov 24  }
  0x25   :  { %54 = vrot.lane.b32.xlu0 %v51_v0, %s178_s0  ;;  %vm61_vm0 = vcmask 64512   ;;  %v50_v3 = vld [vmem:[#allocation2] sm:$0xff]  ;;  %s180_s27 = smov [#allocation8]   ;;  %vm63_vm1 = vcmask 195584   ;;  %vm65_vm2 = vcmask 261120  }
  0x26   :  { %s73_s28 = sshll.u32 %s180_s27, 4  ;;  %s74_s28 = int_to_ptr.vmem [resolvable:$true] %s73_s28 }
  0x27   :  { %s149_s2 = scalar_lea.vmem %s74_s28, 128  ;;  %p154_p2 = scmp.lt.s32.totalorder %s74_s28, %s74_s28 }
  0x28   :  { %p150_p1 = scmp.ne.s32.totalorder %s74_s28, %s149_s2  ;;  %p155_p3 = scmp.lt.s32.totalorder %s149_s2, %s149_s2 }
  0x29   :  { %58 = vrot.lane.b32.xlu0 %v52_v1, %s179_s26 }
  0x2a   :  { %p156_p4 = por %p155_p3, %p154_p2 }
  0x2c   :  { %p157_p5 = pnand %p156_p4, %p150_p1 }
  0x97   :  { %v55_v2 = vpop.permute.xlu0 %54 }
  0x98   :  { %v62_v4 = vsel %vm61_vm0, %v50_v3, %v55_v2 }
  0x9b   :  { %v59_v5 = vpop.permute.xlu0 %58 }
  0x9c   :  { %v64_v6 = vsel %vm63_vm1, %v62_v4, %v59_v5 }
  0x9d   :  { %66 = vst.msk [vmem:[#allocation8] sm:$0xff] %vm65_vm2, %v64_v6 }
  0x9e   :  { %160 = shalt.err (!%p157_p5)
}
  0x9f   :  { %76 = dma.vmem_to_hbm [thread:$0]  %s74_s28, 128, %s216_s3, [#allocation4]  }
  0xa0   :  { %173 = dma.done.wait [#allocation4], 128  }
  0xa1   :  { %174 = vsyncadd [#allocation4], 4294967168 }
  0xa2   :  { %80 = vsyncpa [#allocation3], 1 }
  0xa3   :  { %81 = vsyncpa [#allocation6], 1 }
  0xa4   :  { %82 = vsyncpa [#allocation4], 1 }

</bundles_post_ra>
